<compile_context>
chip_gen: v6e
topology: v6e:2x2x1
jax: 0.10.0
libtpu: 0.0.40
codegen_flags: <defaults>
</compile_context>

<pallas_src>
import functools

import jax
import jax.numpy as jnp
from jax.experimental import pallas as pl
from jax.experimental.pallas import tpu as pltpu


# ----------------------------------------------------------------------------
# Pallas kernel: dual-weight coarse x fine histogram as an MXU matmul, with the
# per-event index math fused in.
# grid = (fine-bin blocks [parallel], event super-blocks [arbitrary]).
# The output block is resident across the event (reduction) axis.
# ----------------------------------------------------------------------------
def _hist_kernel(ev_ref, out_ref, *, n_inner, tn_inner, tf_sub, b1, b2,
                 time_div, patch_size, token_num, wdiv, hdiv, wmul, pw):
    # ev_ref : (5, tn) f32, rows = [wt, dtime_frac, x, y, p] (lane-major)
    # out_ref: (2*b1, tf_out) f32 accumulator (resident across event axis)
    ev_blk = pl.program_id(1)
    two_b1 = out_ref.shape[0]
    tf_out = out_ref.shape[1]
    n_sub = tf_out // tf_sub
    f_base = pl.program_id(0) * tf_out

    # Loop-invariant planes hoisted out of the unrolled chunk loop
    # (JAX does not CSE broadcast_in_dim / iota).
    row_ids = jax.lax.broadcasted_iota(jnp.int32, (two_b1, tn_inner), 0)
    c_ids = row_ids % b1          # coarse-bin id of each output row
    is_w0 = row_ids < b1          # rows [0,b1) use w, rows [b1,2*b1) use wt
    # fine-bin ids on sublanes, NO offset (offset is applied to the key row)
    fbin_iota = jax.lax.broadcasted_iota(jnp.int32, (tf_sub, tn_inner), 0)

    def chunk(j, accs):
        start = pl.multiple_of(j * tn_inner, tn_inner)
        evc = ev_ref[:, pl.ds(start, tn_inner)]          # (5, tn_inner)
        wt_row = evc[0:1, :]
        dt_row = evc[1:2, :]
        x_row = evc[2:3, :]
        y_row = evc[3:4, :]
        p_row = evc[4:5, :]

        # w = (polarity != 2); padded events carry p = 2 and wt = 0.
        w_row = (p_row != 2.0).astype(jnp.float32)

        # Position / Token (floor-div and floor-mod, mod written explicitly so
        # the quotient floor is reused and no float-rem lowering is needed).
        qx = jnp.floor(x_row / wdiv)
        qy = jnp.floor(y_row / hdiv)
        pos = qx + qy * pw
        tok = jnp.floor(x_row - qx * wdiv) + jnp.floor(y_row - qy * hdiv) * wmul

        # index_mapping clamp: [0, bin] inclusive, as in the PyTorch code.
        dt_i = jnp.clip(jnp.floor(dt_row).astype(jnp.int32), 0, time_div)
        pol_i = jnp.clip(p_row.astype(jnp.int32), 0, 2)
        tok_i = jnp.clip(tok.astype(jnp.int32), 0, patch_size)
        pos_i = jnp.clip(pos.astype(jnp.int32), 0, token_num)

        # Factorized flat index l = c*b2 + f; clamp-ceiling overflow of the
        # fine key carries into the next coarse bin (PyTorch bleed semantics).
        f_raw = token_num * tok_i + pos_i
        ovf = (f_raw >= b2).astype(jnp.int32)
        c_key = 2 * dt_i + pol_i + ovf                    # (1, tn_inner)
        f_key = f_raw - b2 * ovf

        # lhs[(j, c), i] = w2[j, i] * (c_key[i] == c)   -> (2*b1, tn_inner)
        lhs = jnp.where(c_ids == c_key,
                        jnp.where(is_w0, w_row, wt_row), 0.0)

        new_accs = []
        for s in range(n_sub):
            off = f_base + s * tf_sub
            # one-hot built transposed (fine bins on sublanes) from the
            # lane-major key row, then fed as onehot.T to the MXU.
            onehot_t = ((f_key - off) == fbin_iota).astype(jnp.float32)
            part = jnp.dot(lhs, onehot_t.T, preferred_element_type=jnp.float32)
            new_accs.append(accs[s] + part)
        return tuple(new_accs)

    init = tuple(jnp.zeros((two_b1, tf_sub), jnp.float32) for _ in range(n_sub))
    accs = jax.lax.fori_loop(0, n_inner, chunk, init, unroll=True)

    @pl.when(ev_blk == 0)
    def _store():
        for s in range(n_sub):
            out_ref[:, s * tf_sub:(s + 1) * tf_sub] = accs[s]

    @pl.when(ev_blk != 0)
    def _accumulate():
        for s in range(n_sub):
            out_ref[:, s * tf_sub:(s + 1) * tf_sub] += accs[s]


def _pick_tf(b2_pad128, tf):
    """Fine-bin block width: single block on 1-TC chips, 128 on v7x."""
    if tf is not None:
        return max(128, min((tf // 128) * 128, b2_pad128))
    cap = 512                       # keeps the static in-kernel sub-tile loop short
    kind = ""
    try:
        kind = jax.devices()[0].device_kind.lower()
    except Exception:
        pass
    if ("v7" in kind or "7x" in kind) and b2_pad128 >= 256:
        return 128                  # >= 2 parallel fine blocks -> both v7x TCs busy
    return min(cap, b2_pad128)


def event_hist_pallas(wt, dtv, xs, ys, ps, *, time_div, patch_size, token_num,
                      wdiv, hdiv, wmul, pw, tn_inner=128, max_inner=8, tf=None):
    """hist[j*b1 + c, f] = sum_i w2[j,i] * (c_i == c) * (f_i == f), computed
    in-kernel from the raw event rows [wt, dtime_frac, x, y, p]."""
    n = int(wt.shape[0])
    b1 = 2 * time_div                 # coarse bins: (DTime, polarity)
    b2 = patch_size * token_num       # fine bins:   (Token, Position)
    two_b1 = 2 * b1

    # Fold up to `max_inner` 128-event chunks into a single grid step.
    n_inner = max(1, min(max_inner, pl.cdiv(n, tn_inner)))
    tn = tn_inner * n_inner
    n_pad = pl.cdiv(n, tn) * tn

    # Lane-dense fine-bin tile (multiple of 128).
    b2_128 = pl.cdiv(b2, 128) * 128
    tf_out = _pick_tf(b2_128, tf)
    b2_pad = pl.cdiv(b2, tf_out) * tf_out

    # One packed lane-major slab; padded events get wt = 0 and p = 2 (=> w = 0)
    # so they contribute nothing to either histogram.
    rows = jnp.stack([wt, dtv, xs, ys, ps], axis=0).astype(jnp.float32)
    slab = (jnp.zeros((5, n_pad), jnp.float32)
            .at[4, :].set(2.0)
            .at[:, :n].set(rows))

    grid = (b2_pad // tf_out, n_pad // tn)
    kernel = functools.partial(
        _hist_kernel, n_inner=n_inner, tn_inner=tn_inner,
        tf_sub=min(128, tf_out), b1=b1, b2=b2, time_div=time_div,
        patch_size=patch_size, token_num=token_num,
        wdiv=wdiv, hdiv=hdiv, wmul=wmul, pw=pw)

    hist = pl.pallas_call(
        kernel,
        out_shape=jax.ShapeDtypeStruct((two_b1, b2_pad), jnp.float32),
        grid_spec=pltpu.PrefetchScalarGridSpec(
            num_scalar_prefetch=0,
            grid=grid,
            in_specs=[pl.BlockSpec((5, tn), lambda b, k: (0, k))],
            out_specs=pl.BlockSpec((two_b1, tf_out), lambda b, k: (0, b)),
        ),
        compiler_params=pltpu.CompilerParams(
            dimension_semantics=("parallel", "arbitrary")),
    )(slab)
    return hist[:, :b2]


# ----------------------------------------------------------------------------
# Module wrapper (glue: time normalization needs t[0]/t[-1], then reshapes).
# ----------------------------------------------------------------------------
class EventToTokenPallas:
    def __init__(self, shape, group_num, patch_size):
        self.H, self.W = shape
        self.time_div = group_num // 2
        if isinstance(patch_size, tuple):
            self.patch_height, self.patch_width = patch_size
        else:
            self.patch_height = self.patch_width = patch_size

    def __call__(self, x):
        # TODO(synk): the PyTorch `x[x != inf].reshape(-1, 4)` filter needs
        # dynamic shapes; here we assume the input events are already finite.
        H, W = self.H, self.W
        PH = int(H / self.patch_height)
        PW = int(W / self.patch_width)
        Token_num = PH * PW
        Patch_size = self.patch_height * self.patch_width
        time_div = self.time_div
        eps = 1e-4
        C = time_div * 2 * 2 * Patch_size

        if x.shape[0] == 0:
            return jnp.zeros((1, C, PH, PW), jnp.float32)

        x = x.astype(jnp.float32)
        t = x[:, 0]
        t0 = t[0]
        tl = t[-1]
        # get_repr weights = [w, wt]; w = (p != 2) is derived in-kernel from p.
        # The +1e-4 (wt) vs +1.0 (DTime) denominators intentionally differ,
        # matching the PyTorch module.
        wt = 1.0 - (t - t0) / (tl - t0 + 1e-4)
        # TODO(synk): PyTorch computes DTime in float64; float32 is exact at
        # this test scale.
        dtv = time_div * (t - t0) / (tl - t0 + 1.0)   # kernel takes floor()

        hist = event_hist_pallas(
            wt, dtv, x[:, 1], x[:, 2], x[:, 3],
            time_div=time_div, patch_size=Patch_size, token_num=Token_num,
            wdiv=(W - 1) / PW + eps, hdiv=(H - 1) / PH + eps,
            wmul=float(int((W + 1) / PW)), pw=float(PW))          # (2*b1, b2)

        # hist[(j, c), f] -> y[dtime, pol, j, token, position]
        y = hist.reshape(2, time_div, 2, Patch_size, Token_num)
        y = jnp.transpose(y, (1, 2, 0, 3, 4))
        return y.reshape(1, -1, PH, PW)


if __name__ == "__main__":
    # Small deterministic config: H=W=16, patch_size=4 -> PH=PW=4, Token_num=16,
    # Patch_size=16; group_num=4 -> time_div=2; B1=4, B2=256, B=1024.
    H = W = 16
    group_num = 4
    patch_size = 4
    N = 200

    key = jax.random.PRNGKey(0)
    kt, kx, ky, kp = jax.random.split(key, 4)
    t = jnp.sort(jax.random.uniform(kt, (N,), jnp.float32, 0.0, 100.0))
    # Quarter-offset integer coordinates keep floor/mod results far from float
    # rounding boundaries (kernel vs XLA reference bit differences).
    xc = jax.random.randint(kx, (N,), 0, W - 1).astype(jnp.float32) + 0.25
    yc = jax.random.randint(ky, (N,), 0, H - 1).astype(jnp.float32) + 0.25
    pol = jax.random.randint(kp, (N,), 0, 3).astype(jnp.float32)  # 0/1 plus "2"s
    events = jnp.stack([t, xc, yc, pol], axis=1)                  # (N, 4)

    mod = EventToTokenPallas((H, W), group_num, patch_size)
    out = jax.block_until_ready(mod(events))

    # sanity: output shape and histogram vs. a pure-JAX segment_sum reference
    PH = H // patch_size
    PW = W // patch_size
    C = (group_num // 2) * 2 * 2 * (patch_size * patch_size)
    assert out.shape == (1, C, PH, PW), out.shape

    # recompute flat l / w / wt exactly as the module does, for a reference check
    time_div = group_num // 2
    Token_num = PH * PW
    Patch_size = patch_size * patch_size
    eps = 1e-4
    w_ref = (pol != 2).astype(jnp.float32)
    wt_ref = 1.0 - (t - t[0]) / (t[-1] - t[0] + 1e-4)
    position = (jnp.floor(xc / ((W - 1) / PW + eps))
                + jnp.floor(yc / ((H - 1) / PH + eps)) * PW)
    token = (jnp.floor(xc % ((W - 1) / PW + eps))
             + jnp.floor(yc % ((H - 1) / PH + eps)) * int((W + 1) / PW))
    dtime = jnp.floor(time_div * (t - t[0]) / (t[-1] - t[0] + 1.0))
    x_nd = jnp.stack([dtime, pol, token, position], 0).astype(jnp.int32)
    bins = jnp.array([time_div, 2, Patch_size, Token_num], jnp.int32)
    y_nd = jnp.minimum(jnp.maximum(x_nd, 0), bins[:, None])
    index = jnp.array([2 * Patch_size * Token_num, Patch_size * Token_num,
                       Token_num, 1], jnp.int32)
    l_ref = jnp.sum(index[:, None] * y_nd, axis=0)
    B = time_div * 2 * Patch_size * Token_num
    ref0 = jax.ops.segment_sum(w_ref, l_ref, num_segments=B)
    ref1 = jax.ops.segment_sum(wt_ref, l_ref, num_segments=B)
    ref_y = jnp.stack([ref0.reshape(time_div, 2, Patch_size, Token_num),
                       ref1.reshape(time_div, 2, Patch_size, Token_num)], axis=2)
    ref_out = ref_y.reshape(1, -1, PH, PW)
    assert jnp.allclose(out, ref_out, atol=1e-4, rtol=1e-4), "mismatch vs reference"

    print("KERNEL_OK")
</pallas_src>

<mosaic_0001>
module attributes {stable_mosaic.version = 11 : i64} {
  func.func @_hist_kernel(%arg0: i32, %arg1: i32, %arg2: memref<5x256xf32, #tpu.memory_space<vmem>>, %arg3: memref<8x256xf32, #tpu.memory_space<vmem>>) attributes {dimension_semantics = [#tpu.dimension_semantics<parallel>, #tpu.dimension_semantics<arbitrary>], iteration_bounds = array<i64: 1, 1>, scalar_prefetch = 0 : i64, scratch_operands = 0 : i64, tpu.core_type = #tpu.core_type<tc>, window_params = [{transform_indices = @transform_0, window_bounds = array<i64: 5, 256>}, {transform_indices = @transform_1, window_bounds = array<i64: 8, 256>}]} {
    %c256_i32 = arith.constant 256 : i32
    %0 = arith.muli %arg0, %c256_i32 : i32
    %1 = tpu.iota {dimensions = array<i32: 0>} : vector<8x128xi32>
    %c4_i32 = arith.constant 4 : i32
    %c0_i32 = arith.constant 0 : i32
    %2 = arith.cmpi eq, %c4_i32, %c0_i32 : i32
    %c1_i32 = arith.constant 1 : i32
    %3 = arith.select %2, %c1_i32, %c4_i32 : i32
    %4 = vector.broadcast %3 : i32 to vector<8x128xi32>
    %5 = arith.remsi %1, %4 : vector<8x128xi32>
    %c0_i32_0 = arith.constant 0 : i32
    %6 = vector.broadcast %c0_i32_0 : i32 to vector<8x128xi32>
    %7 = arith.cmpi ne, %5, %6 : vector<8x128xi32>
    %c0_i32_1 = arith.constant 0 : i32
    %8 = vector.broadcast %c0_i32_1 : i32 to vector<8x128xi32>
    %9 = arith.cmpi slt, %5, %8 : vector<8x128xi32>
    %c0_i32_2 = arith.constant 0 : i32
    %10 = arith.cmpi slt, %3, %c0_i32_2 : i32
    %11 = vector.broadcast %10 : i1 to vector<8x128xi1>
    %12 = vector.broadcast %11 : vector<8x128xi1> to vector<8x128xi1>
    %13 = arith.xori %9, %12 : vector<8x128xi1>
    %14 = arith.andi %13, %7 : vector<8x128xi1>
    %15 = vector.broadcast %3 : i32 to vector<8x128xi32>
    %16 = arith.addi %5, %15 : vector<8x128xi32>
    %17 = arith.select %14, %16, %5 : vector<8x128xi1>, vector<8x128xi32>
    %c4_i32_3 = arith.constant 4 : i32
    %18 = vector.broadcast %c4_i32_3 : i32 to vector<8x128xi32>
    %19 = arith.cmpi slt, %1, %18 : vector<8x128xi32>
    %20 = tpu.iota {dimensions = array<i32: 0>} : vector<128x128xi32>
    %cst = arith.constant 0.000000e+00 : f32
    %21 = vector.broadcast %cst : f32 to vector<8x128xf32>
    %cst_4 = arith.constant 0.000000e+00 : f32
    %22 = vector.broadcast %cst_4 : f32 to vector<8x128xf32>
    %c0_i32_5 = arith.constant 0 : i32
    %c128_i32 = arith.constant 128 : i32
    %23 = arith.muli %c0_i32_5, %c128_i32 : i32
    %24 = tpu.assume_multiple %23, 128 : i32
    %c0 = arith.constant 0 : index
    %25 = arith.index_cast %24 : i32 to index
    %26 = vector.load %arg2[%c0, %25] : memref<5x256xf32, #tpu.memory_space<vmem>>, vector<5x128xf32>
    %27 = vector.extract_strided_slice %26 {offsets = [0, 0], sizes = [1, 128], strides = [1, 1]} : vector<5x128xf32> to vector<1x128xf32>
    %28 = vector.extract_strided_slice %26 {offsets = [1, 0], sizes = [1, 128], strides = [1, 1]} : vector<5x128xf32> to vector<1x128xf32>
    %29 = vector.extract_strided_slice %26 {offsets = [2, 0], sizes = [1, 128], strides = [1, 1]} : vector<5x128xf32> to vector<1x128xf32>
    %30 = vector.extract_strided_slice %26 {offsets = [3, 0], sizes = [1, 128], strides = [1, 1]} : vector<5x128xf32> to vector<1x128xf32>
    %31 = vector.extract_strided_slice %26 {offsets = [4, 0], sizes = [1, 128], strides = [1, 1]} : vector<5x128xf32> to vector<1x128xf32>
    %cst_6 = arith.constant 2.000000e+00 : f32
    %32 = vector.broadcast %cst_6 : f32 to vector<1x128xf32>
    %33 = arith.cmpf one, %31, %32 : vector<1x128xf32>
    %34 = arith.extui %33 : vector<1x128xi1> to vector<1x128xi32>
    %35 = arith.sitofp %34 : vector<1x128xi32> to vector<1x128xf32>
    %cst_7 = arith.constant 3.750100e+00 : f32
    %36 = vector.broadcast %cst_7 : f32 to vector<1x128xf32>
    %37 = arith.divf %29, %36 : vector<1x128xf32>
    %38 = math.floor %37 : vector<1x128xf32>
    %cst_8 = arith.constant 3.750100e+00 : f32
    %39 = vector.broadcast %cst_8 : f32 to vector<1x128xf32>
    %40 = arith.divf %30, %39 : vector<1x128xf32>
    %41 = math.floor %40 : vector<1x128xf32>
    %cst_9 = arith.constant 4.000000e+00 : f32
    %42 = vector.broadcast %cst_9 : f32 to vector<1x128xf32>
    %43 = arith.mulf %41, %42 : vector<1x128xf32>
    %44 = arith.addf %38, %43 : vector<1x128xf32>
    %cst_10 = arith.constant 3.750100e+00 : f32
    %45 = vector.broadcast %cst_10 : f32 to vector<1x128xf32>
    %46 = arith.mulf %38, %45 : vector<1x128xf32>
    %47 = arith.subf %29, %46 : vector<1x128xf32>
    %48 = math.floor %47 : vector<1x128xf32>
    %cst_11 = arith.constant 3.750100e+00 : f32
    %49 = vector.broadcast %cst_11 : f32 to vector<1x128xf32>
    %50 = arith.mulf %41, %49 : vector<1x128xf32>
    %51 = arith.subf %30, %50 : vector<1x128xf32>
    %52 = math.floor %51 : vector<1x128xf32>
    %cst_12 = arith.constant 4.000000e+00 : f32
    %53 = vector.broadcast %cst_12 : f32 to vector<1x128xf32>
    %54 = arith.mulf %52, %53 : vector<1x128xf32>
    %55 = arith.addf %48, %54 : vector<1x128xf32>
    %56 = math.floor %28 : vector<1x128xf32>
    %57 = arith.fptosi %56 : vector<1x128xf32> to vector<1x128xi32>
    %c0_i32_13 = arith.constant 0 : i32
    %c2_i32 = arith.constant 2 : i32
    %58 = vector.broadcast %c0_i32_13 : i32 to vector<1x128xi32>
    %59 = arith.maxsi %58, %57 : vector<1x128xi32>
    %60 = vector.broadcast %c2_i32 : i32 to vector<1x128xi32>
    %61 = arith.minsi %60, %59 : vector<1x128xi32>
    %62 = arith.fptosi %31 : vector<1x128xf32> to vector<1x128xi32>
    %c0_i32_14 = arith.constant 0 : i32
    %c2_i32_15 = arith.constant 2 : i32
    %63 = vector.broadcast %c0_i32_14 : i32 to vector<1x128xi32>
    %64 = arith.maxsi %63, %62 : vector<1x128xi32>
    %65 = vector.broadcast %c2_i32_15 : i32 to vector<1x128xi32>
    %66 = arith.minsi %65, %64 : vector<1x128xi32>
    %67 = arith.fptosi %55 : vector<1x128xf32> to vector<1x128xi32>
    %c0_i32_16 = arith.constant 0 : i32
    %c16_i32 = arith.constant 16 : i32
    %68 = vector.broadcast %c0_i32_16 : i32 to vector<1x128xi32>
    %69 = arith.maxsi %68, %67 : vector<1x128xi32>
    %70 = vector.broadcast %c16_i32 : i32 to vector<1x128xi32>
    %71 = arith.minsi %70, %69 : vector<1x128xi32>
    %72 = arith.fptosi %44 : vector<1x128xf32> to vector<1x128xi32>
    %c0_i32_17 = arith.constant 0 : i32
    %c16_i32_18 = arith.constant 16 : i32
    %73 = vector.broadcast %c0_i32_17 : i32 to vector<1x128xi32>
    %74 = arith.maxsi %73, %72 : vector<1x128xi32>
    %75 = vector.broadcast %c16_i32_18 : i32 to vector<1x128xi32>
    %76 = arith.minsi %75, %74 : vector<1x128xi32>
    %c16_i32_19 = arith.constant 16 : i32
    %77 = vector.broadcast %c16_i32_19 : i32 to vector<1x128xi32>
    %78 = arith.muli %77, %71 : vector<1x128xi32>
    %79 = arith.addi %78, %76 : vector<1x128xi32>
    %c256_i32_20 = arith.constant 256 : i32
    %80 = vector.broadcast %c256_i32_20 : i32 to vector<1x128xi32>
    %81 = arith.cmpi sge, %79, %80 : vector<1x128xi32>
    %82 = arith.extui %81 : vector<1x128xi1> to vector<1x128xi32>
    %c2_i32_21 = arith.constant 2 : i32
    %83 = vector.broadcast %c2_i32_21 : i32 to vector<1x128xi32>
    %84 = arith.muli %83, %61 : vector<1x128xi32>
    %85 = arith.addi %84, %66 : vector<1x128xi32>
    %86 = arith.addi %85, %82 : vector<1x128xi32>
    %c256_i32_22 = arith.constant 256 : i32
    %87 = vector.broadcast %c256_i32_22 : i32 to vector<1x128xi32>
    %88 = arith.muli %87, %82 : vector<1x128xi32>
    %89 = arith.subi %79, %88 : vector<1x128xi32>
    %90 = vector.broadcast %86 : vector<1x128xi32> to vector<8x128xi32>
    %91 = arith.cmpi eq, %17, %90 : vector<8x128xi32>
    %92 = vector.shape_cast %35 : vector<1x128xf32> to vector<1x128xf32>
    %93 = vector.broadcast %92 : vector<1x128xf32> to vector<8x128xf32>
    %94 = vector.shape_cast %27 : vector<1x128xf32> to vector<1x128xf32>
    %95 = vector.broadcast %94 : vector<1x128xf32> to vector<8x128xf32>
    %96 = arith.select %19, %93, %95 : vector<8x128xi1>, vector<8x128xf32>
    %cst_23 = arith.constant 0.000000e+00 : f32
    %97 = vector.broadcast %cst_23 : f32 to vector<8x128xf32>
    %98 = arith.select %91, %96, %97 : vector<8x128xi1>, vector<8x128xf32>
    %c0_i32_24 = arith.constant 0 : i32
    %99 = arith.addi %0, %c0_i32_24 : i32
    %100 = vector.broadcast %99 : i32 to vector<1x128xi32>
    %101 = arith.subi %89, %100 : vector<1x128xi32>
    %102 = vector.broadcast %101 : vector<1x128xi32> to vector<128x128xi32>
    %103 = arith.cmpi eq, %102, %20 : vector<128x128xi32>
    %104 = arith.extui %103 : vector<128x128xi1> to vector<128x128xi32>
    %105 = arith.sitofp %104 : vector<128x128xi32> to vector<128x128xf32>
    %106 = tpu.transpose %105, [1, 0] : vector<128x128xf32> -> vector<128x128xf32>
    %cst_25 = arith.constant dense<0.000000e+00> : vector<8x128xf32>
    %107 = tpu.matmul %98, %106, %cst_25 {dimension_numbers = #tpu.dot_dimension_numbers<[1], [0], [0], [1], [0, 0, 1, 1], [], []>} : vector<8x128xf32>, vector<128x128xf32>, vector<8x128xf32> -> vector<8x128xf32>
    %108 = arith.addf %21, %107 : vector<8x128xf32>
    %c128_i32_26 = arith.constant 128 : i32
    %109 = arith.addi %0, %c128_i32_26 : i32
    %110 = vector.broadcast %109 : i32 to vector<1x128xi32>
    %111 = arith.subi %89, %110 : vector<1x128xi32>
    %112 = vector.broadcast %111 : vector<1x128xi32> to vector<128x128xi32>
    %113 = arith.cmpi eq, %112, %20 : vector<128x128xi32>
    %114 = arith.extui %113 : vector<128x128xi1> to vector<128x128xi32>
    %115 = arith.sitofp %114 : vector<128x128xi32> to vector<128x128xf32>
    %116 = tpu.transpose %115, [1, 0] : vector<128x128xf32> -> vector<128x128xf32>
    %cst_27 = arith.constant dense<0.000000e+00> : vector<8x128xf32>
    %117 = tpu.matmul %98, %116, %cst_27 {dimension_numbers = #tpu.dot_dimension_numbers<[1], [0], [0], [1], [0, 0, 1, 1], [], []>} : vector<8x128xf32>, vector<128x128xf32>, vector<8x128xf32> -> vector<8x128xf32>
    %118 = arith.addf %22, %117 : vector<8x128xf32>
    %c1_i32_28 = arith.constant 1 : i32
    %c128_i32_29 = arith.constant 128 : i32
    %119 = arith.muli %c1_i32_28, %c128_i32_29 : i32
    %120 = tpu.assume_multiple %119, 128 : i32
    %c0_30 = arith.constant 0 : index
    %121 = arith.index_cast %120 : i32 to index
    %122 = vector.load %arg2[%c0_30, %121] : memref<5x256xf32, #tpu.memory_space<vmem>>, vector<5x128xf32>
    %123 = vector.extract_strided_slice %122 {offsets = [0, 0], sizes = [1, 128], strides = [1, 1]} : vector<5x128xf32> to vector<1x128xf32>
    %124 = vector.extract_strided_slice %122 {offsets = [1, 0], sizes = [1, 128], strides = [1, 1]} : vector<5x128xf32> to vector<1x128xf32>
    %125 = vector.extract_strided_slice %122 {offsets = [2, 0], sizes = [1, 128], strides = [1, 1]} : vector<5x128xf32> to vector<1x128xf32>
    %126 = vector.extract_strided_slice %122 {offsets = [3, 0], sizes = [1, 128], strides = [1, 1]} : vector<5x128xf32> to vector<1x128xf32>
    %127 = vector.extract_strided_slice %122 {offsets = [4, 0], sizes = [1, 128], strides = [1, 1]} : vector<5x128xf32> to vector<1x128xf32>
    %cst_31 = arith.constant 2.000000e+00 : f32
    %128 = vector.broadcast %cst_31 : f32 to vector<1x128xf32>
    %129 = arith.cmpf one, %127, %128 : vector<1x128xf32>
    %130 = arith.extui %129 : vector<1x128xi1> to vector<1x128xi32>
    %131 = arith.sitofp %130 : vector<1x128xi32> to vector<1x128xf32>
    %cst_32 = arith.constant 3.750100e+00 : f32
    %132 = vector.broadcast %cst_32 : f32 to vector<1x128xf32>
    %133 = arith.divf %125, %132 : vector<1x128xf32>
    %134 = math.floor %133 : vector<1x128xf32>
    %cst_33 = arith.constant 3.750100e+00 : f32
    %135 = vector.broadcast %cst_33 : f32 to vector<1x128xf32>
    %136 = arith.divf %126, %135 : vector<1x128xf32>
    %137 = math.floor %136 : vector<1x128xf32>
    %cst_34 = arith.constant 4.000000e+00 : f32
    %138 = vector.broadcast %cst_34 : f32 to vector<1x128xf32>
    %139 = arith.mulf %137, %138 : vector<1x128xf32>
    %140 = arith.addf %134, %139 : vector<1x128xf32>
    %cst_35 = arith.constant 3.750100e+00 : f32
    %141 = vector.broadcast %cst_35 : f32 to vector<1x128xf32>
    %142 = arith.mulf %134, %141 : vector<1x128xf32>
    %143 = arith.subf %125, %142 : vector<1x128xf32>
    %144 = math.floor %143 : vector<1x128xf32>
    %cst_36 = arith.constant 3.750100e+00 : f32
    %145 = vector.broadcast %cst_36 : f32 to vector<1x128xf32>
    %146 = arith.mulf %137, %145 : vector<1x128xf32>
    %147 = arith.subf %126, %146 : vector<1x128xf32>
    %148 = math.floor %147 : vector<1x128xf32>
    %cst_37 = arith.constant 4.000000e+00 : f32
    %149 = vector.broadcast %cst_37 : f32 to vector<1x128xf32>
    %150 = arith.mulf %148, %149 : vector<1x128xf32>
    %151 = arith.addf %144, %150 : vector<1x128xf32>
    %152 = math.floor %124 : vector<1x128xf32>
    %153 = arith.fptosi %152 : vector<1x128xf32> to vector<1x128xi32>
    %c0_i32_38 = arith.constant 0 : i32
    %c2_i32_39 = arith.constant 2 : i32
    %154 = vector.broadcast %c0_i32_38 : i32 to vector<1x128xi32>
    %155 = arith.maxsi %154, %153 : vector<1x128xi32>
    %156 = vector.broadcast %c2_i32_39 : i32 to vector<1x128xi32>
    %157 = arith.minsi %156, %155 : vector<1x128xi32>
    %158 = arith.fptosi %127 : vector<1x128xf32> to vector<1x128xi32>
    %c0_i32_40 = arith.constant 0 : i32
    %c2_i32_41 = arith.constant 2 : i32
    %159 = vector.broadcast %c0_i32_40 : i32 to vector<1x128xi32>
    %160 = arith.maxsi %159, %158 : vector<1x128xi32>
    %161 = vector.broadcast %c2_i32_41 : i32 to vector<1x128xi32>
    %162 = arith.minsi %161, %160 : vector<1x128xi32>
    %163 = arith.fptosi %151 : vector<1x128xf32> to vector<1x128xi32>
    %c0_i32_42 = arith.constant 0 : i32
    %c16_i32_43 = arith.constant 16 : i32
    %164 = vector.broadcast %c0_i32_42 : i32 to vector<1x128xi32>
    %165 = arith.maxsi %164, %163 : vector<1x128xi32>
    %166 = vector.broadcast %c16_i32_43 : i32 to vector<1x128xi32>
    %167 = arith.minsi %166, %165 : vector<1x128xi32>
    %168 = arith.fptosi %140 : vector<1x128xf32> to vector<1x128xi32>
    %c0_i32_44 = arith.constant 0 : i32
    %c16_i32_45 = arith.constant 16 : i32
    %169 = vector.broadcast %c0_i32_44 : i32 to vector<1x128xi32>
    %170 = arith.maxsi %169, %168 : vector<1x128xi32>
    %171 = vector.broadcast %c16_i32_45 : i32 to vector<1x128xi32>
    %172 = arith.minsi %171, %170 : vector<1x128xi32>
    %c16_i32_46 = arith.constant 16 : i32
    %173 = vector.broadcast %c16_i32_46 : i32 to vector<1x128xi32>
    %174 = arith.muli %173, %167 : vector<1x128xi32>
    %175 = arith.addi %174, %172 : vector<1x128xi32>
    %c256_i32_47 = arith.constant 256 : i32
    %176 = vector.broadcast %c256_i32_47 : i32 to vector<1x128xi32>
    %177 = arith.cmpi sge, %175, %176 : vector<1x128xi32>
    %178 = arith.extui %177 : vector<1x128xi1> to vector<1x128xi32>
    %c2_i32_48 = arith.constant 2 : i32
    %179 = vector.broadcast %c2_i32_48 : i32 to vector<1x128xi32>
    %180 = arith.muli %179, %157 : vector<1x128xi32>
    %181 = arith.addi %180, %162 : vector<1x128xi32>
    %182 = arith.addi %181, %178 : vector<1x128xi32>
    %c256_i32_49 = arith.constant 256 : i32
    %183 = vector.broadcast %c256_i32_49 : i32 to vector<1x128xi32>
    %184 = arith.muli %183, %178 : vector<1x128xi32>
    %185 = arith.subi %175, %184 : vector<1x128xi32>
    %186 = vector.broadcast %182 : vector<1x128xi32> to vector<8x128xi32>
    %187 = arith.cmpi eq, %17, %186 : vector<8x128xi32>
    %188 = vector.shape_cast %131 : vector<1x128xf32> to vector<1x128xf32>
    %189 = vector.broadcast %188 : vector<1x128xf32> to vector<8x128xf32>
    %190 = vector.shape_cast %123 : vector<1x128xf32> to vector<1x128xf32>
    %191 = vector.broadcast %190 : vector<1x128xf32> to vector<8x128xf32>
    %192 = arith.select %19, %189, %191 : vector<8x128xi1>, vector<8x128xf32>
    %cst_50 = arith.constant 0.000000e+00 : f32
    %193 = vector.broadcast %cst_50 : f32 to vector<8x128xf32>
    %194 = arith.select %187, %192, %193 : vector<8x128xi1>, vector<8x128xf32>
    %c0_i32_51 = arith.constant 0 : i32
    %195 = arith.addi %0, %c0_i32_51 : i32
    %196 = vector.broadcast %195 : i32 to vector<1x128xi32>
    %197 = arith.subi %185, %196 : vector<1x128xi32>
    %198 = vector.broadcast %197 : vector<1x128xi32> to vector<128x128xi32>
    %199 = arith.cmpi eq, %198, %20 : vector<128x128xi32>
    %200 = arith.extui %199 : vector<128x128xi1> to vector<128x128xi32>
    %201 = arith.sitofp %200 : vector<128x128xi32> to vector<128x128xf32>
    %202 = tpu.transpose %201, [1, 0] : vector<128x128xf32> -> vector<128x128xf32>
    %cst_52 = arith.constant dense<0.000000e+00> : vector<8x128xf32>
    %203 = tpu.matmul %194, %202, %cst_52 {dimension_numbers = #tpu.dot_dimension_numbers<[1], [0], [0], [1], [0, 0, 1, 1], [], []>} : vector<8x128xf32>, vector<128x128xf32>, vector<8x128xf32> -> vector<8x128xf32>
    %204 = arith.addf %108, %203 : vector<8x128xf32>
    %c128_i32_53 = arith.constant 128 : i32
    %205 = arith.addi %0, %c128_i32_53 : i32
    %206 = vector.broadcast %205 : i32 to vector<1x128xi32>
    %207 = arith.subi %185, %206 : vector<1x128xi32>
    %208 = vector.broadcast %207 : vector<1x128xi32> to vector<128x128xi32>
    %209 = arith.cmpi eq, %208, %20 : vector<128x128xi32>
    %210 = arith.extui %209 : vector<128x128xi1> to vector<128x128xi32>
    %211 = arith.sitofp %210 : vector<128x128xi32> to vector<128x128xf32>
    %212 = tpu.transpose %211, [1, 0] : vector<128x128xf32> -> vector<128x128xf32>
    %cst_54 = arith.constant dense<0.000000e+00> : vector<8x128xf32>
    %213 = tpu.matmul %194, %212, %cst_54 {dimension_numbers = #tpu.dot_dimension_numbers<[1], [0], [0], [1], [0, 0, 1, 1], [], []>} : vector<8x128xf32>, vector<128x128xf32>, vector<8x128xf32> -> vector<8x128xf32>
    %214 = arith.addf %118, %213 : vector<8x128xf32>
    %c2_i32_55 = arith.constant 2 : i32
    %c0_i32_56 = arith.constant 0 : i32
    %215 = arith.cmpi eq, %arg1, %c0_i32_56 : i32
    %216 = arith.extui %215 : i1 to i32
    %c0_i32_57 = arith.constant 0 : i32
    %217 = arith.cmpi ne, %216, %c0_i32_57 : i32
    scf.if %217 {
      %c0_60 = arith.constant 0 : index
      %c0_61 = arith.constant 0 : index
      %221 = vector.load %arg3[%c0_60, %c0_61] : memref<8x256xf32, #tpu.memory_space<vmem>>, vector<8x128xf32>
      tpu.vector_store %arg3[%c0_60, %c0_61], %204 {strides = array<i32>} : memref<8x256xf32, #tpu.memory_space<vmem>>, vector<8x128xf32>,
      %c0_62 = arith.constant 0 : index
      %c128 = arith.constant 128 : index
      %222 = vector.load %arg3[%c0_62, %c128] : memref<8x256xf32, #tpu.memory_space<vmem>>, vector<8x128xf32>
      tpu.vector_store %arg3[%c0_62, %c128], %214 {strides = array<i32>} : memref<8x256xf32, #tpu.memory_space<vmem>>, vector<8x128xf32>,
    } else {
    }
    %c0_i32_58 = arith.constant 0 : i32
    %218 = arith.cmpi ne, %arg1, %c0_i32_58 : i32
    %219 = arith.extui %218 : i1 to i32
    %c0_i32_59 = arith.constant 0 : i32
    %220 = arith.cmpi ne, %219, %c0_i32_59 : i32
    scf.if %220 {
      %c0_60 = arith.constant 0 : index
      %c0_61 = arith.constant 0 : index
      %221 = vector.load %arg3[%c0_60, %c0_61] : memref<8x256xf32, #tpu.memory_space<vmem>>, vector<8x128xf32>
      %222 = arith.addf %221, %204 : vector<8x128xf32>
      %c0_62 = arith.constant 0 : index
      %c0_63 = arith.constant 0 : index
      %223 = vector.load %arg3[%c0_62, %c0_63] : memref<8x256xf32, #tpu.memory_space<vmem>>, vector<8x128xf32>
      tpu.vector_store %arg3[%c0_62, %c0_63], %222 {strides = array<i32>} : memref<8x256xf32, #tpu.memory_space<vmem>>, vector<8x128xf32>,
      %c0_64 = arith.constant 0 : index
      %c128 = arith.constant 128 : index
      %224 = vector.load %arg3[%c0_64, %c128] : memref<8x256xf32, #tpu.memory_space<vmem>>, vector<8x128xf32>
      %225 = arith.addf %224, %214 : vector<8x128xf32>
      %c0_65 = arith.constant 0 : index
      %c128_66 = arith.constant 128 : index
      %226 = vector.load %arg3[%c0_65, %c128_66] : memref<8x256xf32, #tpu.memory_space<vmem>>, vector<8x128xf32>
      tpu.vector_store %arg3[%c0_65, %c128_66], %225 {strides = array<i32>} : memref<8x256xf32, #tpu.memory_space<vmem>>, vector<8x128xf32>,
    } else {
    }
    return
  }
  func.func @transform_0(%arg0: i32, %arg1: i32) -> (i32, i32) {
    %c0_i32 = arith.constant 0 : i32
    %c0_i32_0 = arith.constant 0 : i32
    return %c0_i32, %arg1 : i32, i32
  }
  func.func @transform_1(%arg0: i32, %arg1: i32) -> (i32, i32) {
    %c0_i32 = arith.constant 0 : i32
    %c0_i32_0 = arith.constant 0 : i32
    return %c0_i32, %arg0 : i32, i32
  }
}

</mosaic_0001>

<bundles_post_ra>
// kernel: tpu_custom_call.1
= control target key start
LH: loop header
LB: loop body
LE: loop exit
PB: predicated region body
PF: predicated region fallthrough
CT: control target
= control target key end

     0   :  { %6 = vsyncpa [#allocation3], 0  ;;  %s1630_s0 = inlined_call_operand.hbm [shape: f32[5,256], index: 0, kind: input, shape index: {}]   ;;  %s1631_s1 = inlined_call_operand.hbm [shape: f32[8,256], index: 1, kind: output, shape index: {}]  }
   0x1   :  { %7 = vsyncpa [#allocation4], 0  ;;  %s1122_s6 = smov [#allocation2]  }
   0x2   :  { %s14_s7 = sshll.u32 %s1122_s6, 4  ;;  %s15_s7 = int_to_ptr.vmem [resolvable:$true] %s14_s7 }
   0x3   :  { %s1086_s8 = scalar_lea.vmem %s15_s7, 256  ;;  %p1091_p1 = scmp.lt.s32.totalorder %s15_s7, %s15_s7 }
   0x4   :  { %p1087_p0 = scmp.ne.s32.totalorder %s15_s7, %s1086_s8  ;;  %p1092_p2 = scmp.lt.s32.totalorder %s1086_s8, %s1086_s8 }
   0x6   :  { %p1093_p3 = por %p1092_p2, %p1091_p1 }
   0x8   :  { %p1094_p4 = pnand %p1093_p3, %p1087_p0 }
   0xa   :  { %1097 = shalt.err (!%p1094_p4)
}
   0xb   :  { %17 = dma.hbm_to_vmem [thread:$0]  %s1630_s0, 256, %s15_s7, [#allocation3]  }
   0xc   :  { %1118 = dma.done.wait [#allocation3], 256  }
   0xd   :  { %1119 = vsyncadd [#allocation3], 4294967040  ;;  %v1123_v0 = vmov 0.0   ;;  %vm1632_vm0 = vmmov 0   ;;  %v22_v1 = vlaneseq  ;;  %v1149_v3 = vld [vmem:[#allocation2] sm:$0x1f] }
   0xe   :  { %916 = vmatprep.subr.mxu0 %v1123_v0  ;;  %951 = vmatprep.subr.mxu1 %v1123_v0  ;;  %v229_v4 = vld [vmem:[#allocation2 + $0x8] sm:$0x1f]  ;;  %v57_v5 = vmul.f32 0.26665956, %v1149_v3  ;;  %v72_v33 = vfloor.f32 %v1149_v3  ;;  %v1058_v34 = vtrunc.f32 %v1149_v3  ;;  %vm53_vm7 = vcmp.ne.f32.partialorder %v1149_v3, 2.0  ;;  %s1127_s0 = smov [#allocation5]  }
   0xf   :  { %948 = vmatprep.mubr.msk.f32.mxu0 %vm1632_vm0, %v1123_v0  ;;  %983 = vmatprep.mubr.msk.f32.mxu1 %vm1632_vm0, %v1123_v0  ;;  %v1147_v2 = vshrl.u32 %v22_v1, 7  ;;  %v233_v6 = vmul.f32 0.26665956, %v229_v4  ;;  %vm230_vm1 = vcmp.ne.f32.partialorder %v229_v4, 2.0  ;;  %v248_v12 = vfloor.f32 %v229_v4  ;;  %s703_s11 = sshll.u32 %s1127_s0, 4  ;;  %s704_s11 = int_to_ptr.vmem [resolvable:$true] %s703_s11 }
  0x10   :  { %v58_v8 = vfloor.f32 %v57_v5  ;;  %v746_v11 = vsel %vm230_vm1, 1.0, %v1123_v0  ;;  %v1066_v13 = vtrunc.f32 %v229_v4  ;;  %v1056_v40 = vtrunc.f32 %v72_v33  ;;  %s1098_s12 = scalar_lea.vmem %s704_s11, 256  ;;  %p1103_p6 = scmp.lt.s32.totalorder %s704_s11, %s704_s11 }
  0x11   :  { %v111_v7 = vsub.s32 4, %v1147_v2  ;;  %v234_v9 = vfloor.f32 %v233_v6  ;;  %v115_v10 = vsub.s32 0, %v1147_v2  ;;  %vm36_vm2 = vcmp.lt.s32.totalorder %v1147_v2, 4  ;;  %p1099_p5 = scmp.ne.s32.totalorder %s704_s11, %s1098_s12  ;;  %p1104_p7 = scmp.lt.s32.totalorder %s1098_s12, %s1098_s12 }
  0x12   :  { %v59_v14 = vmul.f32 4.0, %v58_v8  ;;  %v64_v15 = vmul.f32 3.7501, %v58_v8  ;;  %v1064_v18 = vtrunc.f32 %v248_v12  ;;  %v1067_v19 = vcvt.f32.s32 %v1066_v13 }
  0x13   :  { %v235_v16 = vmul.f32 4.0, %v234_v9  ;;  %v240_v17 = vmul.f32 3.7501, %v234_v9  ;;  %v288_v20 = vrot.slane %v746_v11, %v111_v7  ;;  %v292_v21 = vrot.slane %v229_v4, %v115_v10  ;;  %p1105_p8 = por %p1104_p7, %p1103_p6 }
  0x14   :  { %v61_v22 = vrot.slane %v59_v14, 1  ;;  %v65_v23 = vsub.f32 %v1149_v3, %v64_v15  ;;  %v1065_v26 = vcvt.f32.s32 %v1064_v18  ;;  %vm255_vm3 = vcmp.gt.s32.totalorder %v1067_v19, 0 }
  0x15   :  { %v237_v24 = vrot.slane %v235_v16, 1  ;;  %v241_v25 = vsub.f32 %v229_v4, %v240_v17  ;;  %v1163_v27 = vsel %vm36_vm2, %v288_v20, %v292_v21  ;;  %v256_v32 = vsel %vm255_vm3, %v1067_v19, 0  ;;  %p1106_p9 = pnand %p1105_p8, %p1099_p5 }
  0x16   :  { %v63_v28 = vadd.f32 %v61_v22, %v58_v8  ;;  %v66_v29 = vfloor.f32 %v65_v23  ;;  %vm250_vm4 = vcmp.gt.s32.totalorder %v1065_v26, 0  ;;  %v1059_v41 = vcvt.f32.s32 %v1058_v34 }
  0x17   :  { %v239_v30 = vadd.f32 %v237_v24, %v234_v9  ;;  %v242_v31 = vfloor.f32 %v241_v25  ;;  %v251_v39 = vsel %vm250_vm4, %v1065_v26, 0  ;;  %vm257_vm6 = vcmp.lt.s32.totalorder %v256_v32, 2 }
  0x18   :  { %v67_v35 = vmul.f32 4.0, %v66_v29  ;;  %v1062_v36 = vtrunc.f32 %v63_v28  ;;  %vm252_vm5 = vcmp.lt.s32.totalorder %v251_v39, 2  ;;  %v1057_v46 = vcvt.f32.s32 %v1056_v40 }
  0x19   :  { %v243_v37 = vmul.f32 4.0, %v242_v31  ;;  %v1070_v38 = vtrunc.f32 %v239_v30  ;;  %vm79_vm10 = vcmp.gt.s32.totalorder %v1059_v41, 0  ;;  %v712_v53 = vsel %vm53_vm7, 1.0, %v1123_v0 }
  0x1a   :  { %v69_v42 = vrot.slane %v67_v35, 1  ;;  %v1063_v43 = vcvt.f32.s32 %v1062_v36  ;;  %v253_v54 = vsel %vm252_vm5, %v251_v39, 2  ;;  %v258_v55 = vsel %vm257_vm6, %v256_v32, 2 }
  0x1b   :  { %v245_v44 = vrot.slane %v243_v37, 1  ;;  %v1071_v45 = vcvt.f32.s32 %v1070_v38  ;;  %vm74_vm12 = vcmp.gt.s32.totalorder %v1057_v46, 0  ;;  %v80_v59 = vsel %vm79_vm10, %v1059_v41, 0 }
  0x1c   :  { %v71_v47 = vadd.f32 %v69_v42, %v66_v29  ;;  %vm89_vm8 = vcmp.gt.s32.totalorder %v1063_v43, 0  ;;  %v75_v58 = vsel %vm74_vm12, %v1057_v46, 0  ;;  %vm81_vm15 = vcmp.lt.s32.totalorder %v80_v59, 2 }
  0x1d   :  { %v247_v48 = vadd.f32 %v245_v44, %v242_v31  ;;  %vm265_vm9 = vcmp.gt.s32.totalorder %v1071_v45, 0  ;;  %v90_v49 = vsel %vm89_vm8, %v1063_v43, 0  ;;  %vm76_vm14 = vcmp.lt.s32.totalorder %v75_v58, 2 }
  0x1e   :  { %v1060_v50 = vtrunc.f32 %v71_v47  ;;  %v266_v52 = vsel %vm265_vm9, %v1071_v45, 0  ;;  %vm91_vm11 = vcmp.lt.s32.totalorder %v90_v49, 16  ;;  %v112_v60 = vrot.slane %v712_v53, %v111_v7 }
  0x1f   :  { %v1068_v51 = vtrunc.f32 %v247_v48  ;;  %vm267_vm13 = vcmp.lt.s32.totalorder %v266_v52, 16  ;;  %v274_v61 = vrot.slane %v258_v55, 3  ;;  %v77_v62 = vsel %vm76_vm14, %v75_v58, 2 }
  0x20   :  { %v1061_v56 = vcvt.f32.s32 %v1060_v50  ;;  %v92_v1 = vsel %vm91_vm11, %v90_v49, 16  ;;  %v82_v5 = vsel %vm81_vm15, %v80_v59, 2  ;;  %v268_v6 = vsel %vm267_vm13, %v266_v52, 16 }
  0x21   :  { %v1069_v57 = vcvt.f32.s32 %v1068_v51  ;;  %v116_v8 = vrot.slane %v1149_v3, %v115_v10  ;;  %v273_v12 = vmul.u32 2, %v253_v54  ;;  %v97_v7 = vmul.u32 2, %v77_v62 }
  0x22   :  { %vm84_vm1 = vcmp.gt.s32.totalorder %v1061_v56, 0  ;;  %v98_v15 = vrot.slane %v82_v5, 3  ;;  %v1125_v21 = vmov 0   ;;  %v123_v3 = vsub.s32 2, %v1147_v2 }
  0x23   :  { %vm260_vm3 = vcmp.gt.s32.totalorder %v1069_v57, 0  ;;  %v85_v63 = vsel %vm84_vm1, %v1061_v56, 0  ;;  %v1177_v16 = vsel %vm36_vm2, %v112_v60, %v116_v8  ;;  %v275_v19 = vadd.s32 %v274_v61, %v273_v12 }
  0x24   :  { %v261_v4 = vsel %vm260_vm3, %v1069_v57, 0  ;;  %vm86_vm4 = vcmp.lt.s32.totalorder %v85_v63, 16  ;;  %v99_v20 = vadd.s32 %v98_v15, %v97_v7  ;;  %v1181_v28 = vadd.s32 120, %v1147_v2 }
  0x25   :  { %vm262_vm5 = vcmp.lt.s32.totalorder %v261_v4, 16  ;;  %v87_v9 = vsel %vm86_vm4, %v85_v63, 16  ;;  %v106_v29 = vsub.s32 1, %v1147_v2  ;;  %v1189_v36 = vadd.s32 112, %v1147_v2 }
  0x26   :  { %v263_v11 = vsel %vm262_vm5, %v261_v4, 16  ;;  %v93_v13 = vmul.u32 16, %v87_v9  ;;  %v1126_v40 = vmov 1.0   ;;  %v1204_v42 = vadd.s32 104, %v1147_v2 }
  0x27   :  { %v269_v14 = vmul.u32 16, %v263_v11  ;;  %v1207_v43 = vadd.s32 96, %v1147_v2  ;;  %v1214_v45 = vadd.s32 88, %v1147_v2  ;;  %v28_v46 = vand.u32 3, %v1147_v2 }
  0x28   :  { %v94_v17 = vadd.s32 %v93_v13, %v92_v1  ;;  %v1226_v48 = vadd.s32 80, %v1147_v2  ;;  %v1229_v49 = vadd.s32 72, %v1147_v2  ;;  %v1232_v50 = vadd.s32 64, %v1147_v2 }
  0x29   :  { %v270_v18 = vadd.s32 %v269_v14, %v268_v6  ;;  %v1235_v51 = vadd.s32 56, %v1147_v2  ;;  %v1242_v52 = vadd.s32 48, %v1147_v2  ;;  %v1245_v53 = vadd.s32 40, %v1147_v2 }
  0x2a   :  { %vm95_vm6 = vcmp.ge.s32.totalorder %v94_v17, 256  ;;  %v1254_v54 = vadd.s32 32, %v1147_v2  ;;  %v1267_v56 = vadd.s32 24, %v1147_v2  ;;  %v1302_v58 = vadd.s32 16, %v1147_v2 }
  0x2b   :  { %vm271_vm7 = vcmp.ge.s32.totalorder %v270_v18, 256  ;;  %v96_v22 = vsel %vm95_vm6, 1, %v1125_v21  ;;  %v1313_v59 = vadd.s32 8, %v1147_v2 }
  0x2c   :  { %v272_v10 = vsel %vm271_vm7, 1, %v1125_v21  ;;  %v102_v23 = vmul.u32 256, %v96_v22  ;;  %v100_v26 = vrot.slane %v96_v22, 1 }
  0x2d   :  { %v278_v24 = vmul.u32 256, %v272_v10  ;;  %v276_v25 = vrot.slane %v272_v10, 1 }
  0x2e   :  { %v103_v30 = vsub.s32 %v94_v17, %v102_v23  ;;  %v101_v33 = vadd.s32 %v100_v26, %v99_v20 }
  0x2f   :  { %v279_v31 = vsub.s32 %v270_v18, %v278_v24  ;;  %v277_v32 = vadd.s32 %v276_v25, %v275_v19 }
  0x30   :  { %v1184_v34 = vrot.slane %v103_v30, %v123_v3  ;;  %v107_v38 = vrot.slane %v101_v33, %v106_v29  ;;  %v729_v39 = vadd.s32 4294967168, %v103_v30 }
  0x31   :  { %v1186_v35 = vrot.slane %v279_v31, %v123_v3  ;;  %v283_v37 = vrot.slane %v277_v32, %v106_v29  ;;  %v797_v41 = vadd.s32 4294967168, %v279_v31 }
  0x32   :  { %vm140_vm8 = vcmp.eq.s32.totalorder %v1184_v34, %v1181_v28  ;;  %vm139_vm10 = vcmp.eq.s32.totalorder %v1184_v34, %v1189_v36  ;;  %v1209_v44 = vrot.slane %v729_v39, %v123_v3  ;;  %vm138_vm12 = vcmp.eq.s32.totalorder %v1184_v34, %v1204_v42 }
  0x33   :  { %vm315_vm2 = vcmp.eq.s32.totalorder %v1186_v35, %v1181_v28  ;;  %952 = vmatpush3.xpose.msk.msra.mxu1 %vm140_vm8, %v1126_v40  ;;  %vm314_vm9 = vcmp.eq.s32.totalorder %v1186_v35, %v1189_v36  ;;  %v1217_v47 = vrot.slane %v797_v41, %v123_v3  ;;  %vm313_vm11 = vcmp.eq.s32.totalorder %v1186_v35, %v1204_v42 }
  0x34   :  { %917 = vmatpush3.xpose.msk.msra.mxu0 %vm315_vm2, %v1126_v40  ;;  %953 = vmatprep.subr.mxu1 %v1123_v0  ;;  %vm312_vm13 = vcmp.eq.s32.totalorder %v1186_v35, %v1207_v43  ;;  %vm137_vm14 = vcmp.eq.s32.totalorder %v1184_v34, %v1207_v43  ;;  %vm311_vm15 = vcmp.eq.s32.totalorder %v1186_v35, %v1214_v45 }
  0x35   :  { %918 = vmatprep.subr.mxu0 %v1123_v0  ;;  %vm136_vm1 = vcmp.eq.s32.totalorder %v1184_v34, %v1214_v45  ;;  %vm1256_vm3 = vcmp.eq.s32.totalorder %v28_v46, %v283_v37  ;;  %vm310_vm4 = vcmp.eq.s32.totalorder %v1186_v35, %v1226_v48  ;;  %vm135_vm5 = vcmp.eq.s32.totalorder %v1184_v34, %v1226_v48 }
  0x36   :  { %vm1269_vm6 = vcmp.eq.s32.totalorder %v28_v46, %v107_v38  ;;  %vm508_vm7 = vcmp.eq.s32.totalorder %v1217_v47, %v1181_v28  ;;  %vm187_vm8 = vcmp.eq.s32.totalorder %v1209_v44, %v1235_v51  ;;  %vm495_vm0 = vcmp.eq.s32.totalorder %v1217_v47, %v1302_v58 }
  0x37   :  { %954 = vmatpush3.xpose.msk.msra.mxu1 %vm139_vm10, %v1126_v40  ;;  %vm506_vm10 = vcmp.eq.s32.totalorder %v1217_v47, %v1204_v42  ;;  %vm494_vm2 = vcmp.eq.s32.totalorder %v1217_v47, %v1313_v59 }
  0x38   :  { %919 = vmatpush3.xpose.msk.msra.mxu0 %vm314_vm9, %v1126_v40  ;;  %955 = vmatprep.subr.mxu1 %v1123_v0  ;;  %vm194_vm9 = vcmp.eq.s32.totalorder %v1209_v44, %v1189_v36 }
  0x39   :  { %920 = vmatprep.subr.mxu0 %v1123_v0 }
  0x3b   :  { %956 = vmatpush3.xpose.msk.msra.mxu1 %vm138_vm12, %v1126_v40  ;;  %vm499_vm12 = vcmp.eq.s32.totalorder %v1217_v47, %v1242_v52 }
  0x3c   :  { %921 = vmatpush3.xpose.msk.msra.mxu0 %vm313_vm11, %v1126_v40  ;;  %957 = vmatprep.subr.mxu1 %v1123_v0  ;;  %vm186_vm11 = vcmp.eq.s32.totalorder %v1209_v44, %v1242_v52 }
  0x3d   :  { %922 = vmatprep.subr.mxu0 %v1123_v0 }
  0x3f   :  { %958 = vmatpush3.xpose.msk.msra.mxu1 %vm137_vm14, %v1126_v40  ;;  %vm134_vm14 = vcmp.eq.s32.totalorder %v1184_v34, %v1229_v49 }
  0x40   :  { %923 = vmatpush3.xpose.msk.msra.mxu0 %vm312_vm13, %v1126_v40  ;;  %959 = vmatprep.subr.mxu1 %v1123_v0  ;;  %vm309_vm13 = vcmp.eq.s32.totalorder %v1186_v35, %v1229_v49 }
  0x41   :  { %924 = vmatprep.subr.mxu0 %v1123_v0 }
  0x43   :  { %960 = vmatpush3.xpose.msk.msra.mxu1 %vm136_vm1, %v1126_v40  ;;  %vm181_vm1 = vcmp.eq.s32.totalorder %v1209_v44, %v1313_v59 }
  0x44   :  { %925 = vmatpush3.xpose.msk.msra.mxu0 %vm311_vm15, %v1126_v40  ;;  %961 = vmatprep.subr.mxu1 %v1123_v0  ;;  %vm182_vm15 = vcmp.eq.s32.totalorder %v1209_v44, %v1302_v58 }
  0x45   :  { %926 = vmatprep.subr.mxu0 %v1123_v0 }
  0x47   :  { %962 = vmatpush3.xpose.msk.msra.mxu1 %vm135_vm5, %v1126_v40  ;;  %vm133_vm5 = vcmp.eq.s32.totalorder %v1184_v34, %v1232_v50 }
  0x48   :  { %927 = vmatpush3.xpose.msk.msra.mxu0 %vm310_vm4, %v1126_v40  ;;  %963 = vmatprep.subr.mxu1 %v1123_v0  ;;  %vm308_vm4 = vcmp.eq.s32.totalorder %v1186_v35, %v1232_v50 }
  0x49   :  { %928 = vmatprep.subr.mxu0 %v1123_v0 }
  0x4b   :  { %964 = vmatpush3.xpose.msk.msra.mxu1 %vm134_vm14, %v1126_v40  ;;  %vm132_vm14 = vcmp.eq.s32.totalorder %v1184_v34, %v1235_v51 }
  0x4c   :  { %929 = vmatpush3.xpose.msk.msra.mxu0 %vm309_vm13, %v1126_v40  ;;  %965 = vmatprep.subr.mxu1 %v1123_v0  ;;  %vm307_vm13 = vcmp.eq.s32.totalorder %v1186_v35, %v1235_v51 }
  0x4d   :  { %930 = vmatprep.subr.mxu0 %v1123_v0 }
  0x4f   :  { %966 = vmatpush3.xpose.msk.msra.mxu1 %vm133_vm5, %v1126_v40  ;;  %vm131_vm5 = vcmp.eq.s32.totalorder %v1184_v34, %v1242_v52 }
  0x50   :  { %931 = vmatpush3.xpose.msk.msra.mxu0 %vm308_vm4, %v1126_v40  ;;  %967 = vmatprep.subr.mxu1 %v1123_v0  ;;  %vm306_vm4 = vcmp.eq.s32.totalorder %v1186_v35, %v1242_v52 }
  0x51   :  { %932 = vmatprep.subr.mxu0 %v1123_v0 }
  0x53   :  { %968 = vmatpush3.xpose.msk.msra.mxu1 %vm132_vm14, %v1126_v40  ;;  %vm130_vm14 = vcmp.eq.s32.totalorder %v1184_v34, %v1245_v53 }
  0x54   :  { %933 = vmatpush3.xpose.msk.msra.mxu0 %vm307_vm13, %v1126_v40  ;;  %969 = vmatprep.subr.mxu1 %v1123_v0  ;;  %vm305_vm13 = vcmp.eq.s32.totalorder %v1186_v35, %v1245_v53 }
  0x55   :  { %934 = vmatprep.subr.mxu0 %v1123_v0 }
  0x57   :  { %970 = vmatpush3.xpose.msk.msra.mxu1 %vm131_vm5, %v1126_v40  ;;  %vm129_vm5 = vcmp.eq.s32.totalorder %v1184_v34, %v1254_v54 }
  0x58   :  { %935 = vmatpush3.xpose.msk.msra.mxu0 %vm306_vm4, %v1126_v40  ;;  %971 = vmatprep.subr.mxu1 %v1123_v0  ;;  %vm304_vm4 = vcmp.eq.s32.totalorder %v1186_v35, %v1254_v54 }
  0x59   :  { %936 = vmatprep.subr.mxu0 %v1123_v0 }
  0x5b   :  { %972 = vmatpush3.xpose.msk.msra.mxu1 %vm130_vm14, %v1126_v40  ;;  %vm128_vm14 = vcmp.eq.s32.totalorder %v1184_v34, %v1267_v56 }
  0x5c   :  { %937 = vmatpush3.xpose.msk.msra.mxu0 %vm305_vm13, %v1126_v40  ;;  %973 = vmatprep.subr.mxu1 %v1123_v0  ;;  %vm303_vm13 = vcmp.eq.s32.totalorder %v1186_v35, %v1267_v56 }
  0x5d   :  { %938 = vmatprep.subr.mxu0 %v1123_v0 }
  0x5f   :  { %974 = vmatpush3.xpose.msk.msra.mxu1 %vm129_vm5, %v1126_v40  ;;  %vm127_vm5 = vcmp.eq.s32.totalorder %v1184_v34, %v1302_v58 }
  0x60   :  { %939 = vmatpush3.xpose.msk.msra.mxu0 %vm304_vm4, %v1126_v40  ;;  %975 = vmatprep.subr.mxu1 %v1123_v0  ;;  %vm302_vm4 = vcmp.eq.s32.totalorder %v1186_v35, %v1302_v58 }
  0x61   :  { %940 = vmatprep.subr.mxu0 %v1123_v0 }
  0x63   :  { %976 = vmatpush3.xpose.msk.msra.mxu1 %vm128_vm14, %v1126_v40  ;;  %vm126_vm14 = vcmp.eq.s32.totalorder %v1184_v34, %v1313_v59 }
  0x64   :  { %941 = vmatpush3.xpose.msk.msra.mxu0 %vm303_vm13, %v1126_v40  ;;  %977 = vmatprep.subr.mxu1 %v1123_v0  ;;  %vm301_vm13 = vcmp.eq.s32.totalorder %v1186_v35, %v1313_v59 }
  0x65   :  { %942 = vmatprep.subr.mxu0 %v1123_v0 }
  0x67   :  { %978 = vmatpush3.xpose.msk.msra.mxu1 %vm127_vm5, %v1126_v40  ;;  %vm125_vm5 = vcmp.eq.s32.totalorder %v1184_v34, %v1147_v2 }
  0x68   :  { %943 = vmatpush3.xpose.msk.msra.mxu0 %vm302_vm4, %v1126_v40  ;;  %979 = vmatprep.subr.mxu1 %v1123_v0  ;;  %vm300_vm4 = vcmp.eq.s32.totalorder %v1186_v35, %v1147_v2 }
  0x69   :  { %944 = vmatprep.subr.mxu0 %v1123_v0 }
  0x6b   :  { %980 = vmatpush3.xpose.msk.msra.mxu1 %vm126_vm14, %v1126_v40  ;;  %vm1639_vm14 = vmmov 0  }
  0x6c   :  { %945 = vmatpush3.xpose.msk.msra.mxu0 %vm301_vm13, %v1126_v40  ;;  %981 = vmatprep.subr.mxu1 %v1123_v0  ;;  %vm1638_vm13 = vcmp.eq.s32.totalorder %v1209_v44, %v1181_v28 }
  0x6d   :  { %946 = vmatprep.subr.mxu0 %v1123_v0 }
  0x6f   :  { %982 = vmatpush3.xpose.msk.msra.mxu1 %vm125_vm5, %v1126_v40  ;;  %vm1643_vm5 = vcmp.eq.s32.totalorder %v1209_v44, %v1207_v43 }
  0x70   :  { %947 = vmatpush3.xpose.msk.msra.mxu0 %vm300_vm4, %v1126_v40  ;;  %1021 = vmatprep.subr.mxu1 %v1123_v0  ;;  %vm1640_vm4 = vcmp.eq.s32.totalorder %v1217_v47, %v1189_v36 }
  0x71   :  { %986 = vmatprep.subr.mxu0 %v1123_v0 }
  0x72   :  { %984 = vmatmul.mubr.msk.f32.vlgmr.msra.gmra.mxu1 %vm1269_vm6, %v1177_v16 }
  0x73   :  { %949 = vmatmul.mubr.msk.f32.vlgmr.msra.gmra.mxu0 %vm1256_vm3, %v1163_v27  ;;  %1022 = vmatpush3.xpose.msk.msra.mxu1 %vm1638_vm13, %v1126_v40  ;;  %vm1645_vm13 = vcmp.eq.s32.totalorder %v1209_v44, %v1214_v45 }
  0x74   :  { %987 = vmatpush3.xpose.msk.msra.mxu0 %vm508_vm7, %v1126_v40  ;;  %1023 = vmatprep.subr.mxu1 %v1123_v0  ;;  %vm1641_vm7 = vcmp.eq.s32.totalorder %v1209_v44, %v1204_v42 }
  0x75   :  { %988 = vmatprep.subr.mxu0 %v1123_v0  ;;  %1018 = vmatprep.mubr.msk.f32.mxu0 %vm1639_vm14, %v1123_v0 }
  0x76   :  { %1053 = vmatprep.mubr.msk.f32.mxu1 %vm1639_vm14, %v1123_v0  ;;  %vm1646_vm14 = vcmp.eq.s32.totalorder %v1217_v47, %v1226_v48 }
  0x77   :  { %1024 = vmatpush3.xpose.msk.msra.mxu1 %vm194_vm9, %v1126_v40  ;;  %vm1642_vm9 = vcmp.eq.s32.totalorder %v1217_v47, %v1207_v43 }
  0x78   :  { %989 = vmatpush3.xpose.msk.msra.mxu0 %vm1640_vm4, %v1126_v40  ;;  %1025 = vmatprep.subr.mxu1 %v1123_v0  ;;  %vm1647_vm4 = vcmp.eq.s32.totalorder %v1209_v44, %v1226_v48 }
  0x79   :  { %990 = vmatprep.subr.mxu0 %v1123_v0 }
  0x7b   :  { %1026 = vmatpush3.xpose.msk.msra.mxu1 %vm1641_vm7, %v1126_v40  ;;  %vm1648_vm7 = vcmp.eq.s32.totalorder %v1217_v47, %v1229_v49 }
  0x7c   :  { %991 = vmatpush3.xpose.msk.msra.mxu0 %vm506_vm10, %v1126_v40  ;;  %1027 = vmatprep.subr.mxu1 %v1123_v0  ;;  %vm1644_vm10 = vcmp.eq.s32.totalorder %v1217_v47, %v1214_v45 }
  0x7d   :  { %992 = vmatprep.subr.mxu0 %v1123_v0 }
  0x7f   :  { %1028 = vmatpush3.xpose.msk.msra.mxu1 %vm1643_vm5, %v1126_v40  ;;  %vm1650_vm5 = vcmp.eq.s32.totalorder %v1217_v47, %v1232_v50 }
  0x80   :  { %993 = vmatpush3.xpose.msk.msra.mxu0 %vm1642_vm9, %v1126_v40  ;;  %1029 = vmatprep.subr.mxu1 %v1123_v0  ;;  %vm1649_vm9 = vcmp.eq.s32.totalorder %v1209_v44, %v1229_v49 }
  0x81   :  { %994 = vmatprep.subr.mxu0 %v1123_v0 }
  0x83   :  { %1030 = vmatpush3.xpose.msk.msra.mxu1 %vm1645_vm13, %v1126_v40  ;;  %vm1652_vm13 = vcmp.eq.s32.totalorder %v1217_v47, %v1235_v51 }
  0x84   :  { %995 = vmatpush3.xpose.msk.msra.mxu0 %vm1644_vm10, %v1126_v40  ;;  %1031 = vmatprep.subr.mxu1 %v1123_v0  ;;  %vm1651_vm10 = vcmp.eq.s32.totalorder %v1209_v44, %v1232_v50 }
  0x85   :  { %996 = vmatprep.subr.mxu0 %v1123_v0 }
  0x87   :  { %1032 = vmatpush3.xpose.msk.msra.mxu1 %vm1647_vm4, %v1126_v40  ;;  %vm1657_vm4 = vcmp.eq.s32.totalorder %v1217_v47, %v1267_v56 }
  0x88   :  { %997 = vmatpush3.xpose.msk.msra.mxu0 %vm1646_vm14, %v1126_v40  ;;  %1033 = vmatprep.subr.mxu1 %v1123_v0  ;;  %vm1654_vm14 = vcmp.eq.s32.totalorder %v1209_v44, %v1245_v53 }
  0x89   :  { %998 = vmatprep.subr.mxu0 %v1123_v0 }
  0x8b   :  { %1034 = vmatpush3.xpose.msk.msra.mxu1 %vm1649_vm9, %v1126_v40 }
  0x8c   :  { %999 = vmatpush3.xpose.msk.msra.mxu0 %vm1648_vm7, %v1126_v40  ;;  %1035 = vmatprep.subr.mxu1 %v1123_v0  ;;  %vm1658_vm7 = vcmp.eq.s32.totalorder %v1209_v44, %v1267_v56 }
  0x8d   :  { %1000 = vmatprep.subr.mxu0 %v1123_v0 }
  0x8f   :  { %1036 = vmatpush3.xpose.msk.msra.mxu1 %vm1651_vm10, %v1126_v40 }
  0x90   :  { %1001 = vmatpush3.xpose.msk.msra.mxu0 %vm1650_vm5, %v1126_v40  ;;  %1037 = vmatprep.subr.mxu1 %v1123_v0 }
  0x91   :  { %1002 = vmatprep.subr.mxu0 %v1123_v0 }
  0x93   :  { %1038 = vmatpush3.xpose.msk.msra.mxu1 %vm187_vm8, %v1126_v40  ;;  %vm1653_vm8 = vcmp.eq.s32.totalorder %v1217_v47, %v1245_v53 }
  0x94   :  { %1003 = vmatpush3.xpose.msk.msra.mxu0 %vm1652_vm13, %v1126_v40  ;;  %1039 = vmatprep.subr.mxu1 %v1123_v0 }
  0x95   :  { %1004 = vmatprep.subr.mxu0 %v1123_v0 }
  0x97   :  { %1040 = vmatpush3.xpose.msk.msra.mxu1 %vm186_vm11, %v1126_v40  ;;  %vm1655_vm11 = vcmp.eq.s32.totalorder %v1217_v47, %v1254_v54 }
  0x98   :  { %1005 = vmatpush3.xpose.msk.msra.mxu0 %vm499_vm12, %v1126_v40  ;;  %1041 = vmatprep.subr.mxu1 %v1123_v0  ;;  %vm1656_vm12 = vcmp.eq.s32.totalorder %v1209_v44, %v1254_v54 }
  0x99   :  { %1006 = vmatprep.subr.mxu0 %v1123_v0 }
  0x9b   :  { %1042 = vmatpush3.xpose.msk.msra.mxu1 %vm1654_vm14, %v1126_v40 }
  0x9c   :  { %1007 = vmatpush3.xpose.msk.msra.mxu0 %vm1653_vm8, %v1126_v40  ;;  %1043 = vmatprep.subr.mxu1 %v1123_v0 }
  0x9d   :  { %1008 = vmatprep.subr.mxu0 %v1123_v0 }
  0x9f   :  { %1044 = vmatpush3.xpose.msk.msra.mxu1 %vm1656_vm12, %v1126_v40 }
  0xa0   :  { %1009 = vmatpush3.xpose.msk.msra.mxu0 %vm1655_vm11, %v1126_v40  ;;  %1045 = vmatprep.subr.mxu1 %v1123_v0 }
  0xa1   :  { %1010 = vmatprep.subr.mxu0 %v1123_v0 }
  0xa3   :  { %1046 = vmatpush3.xpose.msk.msra.mxu1 %vm1658_vm7, %v1126_v40 }
  0xa4   :  { %1011 = vmatpush3.xpose.msk.msra.mxu0 %vm1657_vm4, %v1126_v40  ;;  %1047 = vmatprep.subr.mxu1 %v1123_v0 }
  0xa5   :  { %1012 = vmatprep.subr.mxu0 %v1123_v0 }
  0xa7   :  { %1048 = vmatpush3.xpose.msk.msra.mxu1 %vm182_vm15, %v1126_v40  ;;  %vm1660_vm15 = vcmp.eq.s32.totalorder %v1209_v44, %v1147_v2 }
  0xa8   :  { %1013 = vmatpush3.xpose.msk.msra.mxu0 %vm495_vm0, %v1126_v40  ;;  %1049 = vmatprep.subr.mxu1 %v1123_v0  ;;  %vm1659_vm0 = vcmp.eq.s32.totalorder %v1217_v47, %v1147_v2 }
  0xa9   :  { %1014 = vmatprep.subr.mxu0 %v1123_v0 }
  0xab   :  { %1050 = vmatpush3.xpose.msk.msra.mxu1 %vm181_vm1, %v1126_v40 }
  0xac   :  { %1015 = vmatpush3.xpose.msk.msra.mxu0 %vm494_vm2, %v1126_v40  ;;  %1051 = vmatprep.subr.mxu1 %v1123_v0 }
  0xad   :  { %1016 = vmatprep.subr.mxu0 %v1123_v0 }
  0xaf   :  { %1052 = vmatpush3.xpose.msk.msra.mxu1 %vm1660_vm15, %v1126_v40 }
  0xb0   :  { %1017 = vmatpush3.xpose.msk.msra.mxu0 %vm1659_vm0, %v1126_v40 }
  0xb2   :  { %1054 = vmatmul.mubr.msk.f32.vlgmr.msra.gmra.mxu1 %vm1269_vm6, %v1177_v16 }
  0xb3   :  { %1019 = vmatmul.mubr.msk.f32.vlgmr.msra.gmra.mxu0 %vm1256_vm3, %v1163_v27 }
 0x132   :  { %v484_v0 = vpop.f32.mrf.mxu1 }
 0x133   :  { %v414_v60 = vpop.f32.mrf.mxu0 }
 0x134   :  { %v485_v61 = vadd.f32 %v484_v0, %v414_v60  ;;  %v985_v63 = vpop.f32.mrf.mxu1 }
 0x135   :  { %v950_v62 = vpop.f32.mrf.mxu0 }
 0x136   :  { %685 = vst [vmem:[#allocation5] sm:$0xff] %v485_v61 }
 0x172   :  { %v677_v4 = vpop.f32.mrf.mxu1 }
 0x173   :  { %v607_v1 = vpop.f32.mrf.mxu0 }
 0x174   :  { %v678_v2 = vadd.f32 %v677_v4, %v607_v1  ;;  %v1055_v6 = vpop.f32.mrf.mxu1 }
 0x175   :  { %v1020_v5 = vpop.f32.mrf.mxu0 }
 0x176   :  { %686 = vst [vmem:[#allocation5 + $0x8] sm:$0xff] %v678_v2 }
 0x177   :  { %1109 = shalt.err (!%p1106_p9)
}
 0x178   :  { %706 = dma.vmem_to_hbm [thread:$0]  %s704_s11, 256, %s1631_s1, [#allocation4]  }
 0x179   :  { %1120 = dma.done.wait [#allocation4], 256  }
 0x17a   :  { %1121 = vsyncadd [#allocation4], 4294967040 }
 0x17b   :  { %710 = vsyncpa [#allocation3], 1 }
 0x17c   :  { %711 = vsyncpa [#allocation4], 1 }

</bundles_post_ra>
